<compile_context>
chip_gen: v7x
topology: tpu7x:2x2x1
jax: 0.10.0
libtpu: 0.0.40
codegen_flags: <defaults>
</compile_context>

<pallas_src>
import functools
import math

import jax
import jax.numpy as jnp
from jax import lax
from jax.experimental import pallas as pl
from jax.experimental.pallas import tpu as pltpu


MASK_VALUE = -1e30  # large finite negative; avoids inf arithmetic edge cases


# ----------------------------- in-kernel helpers -----------------------------

def _layernorm_f32(x, w, b, eps=1e-5):
    # PyTorch nn.LayerNorm: population variance, eps inside sqrt. Kept in f32 (VPU).
    mu = jnp.mean(x, axis=-1, keepdims=True)
    var = jnp.mean((x - mu) ** 2, axis=-1, keepdims=True)
    return (x - mu) * lax.rsqrt(var + eps) * w + b


def _new_gelu(x):
    c = math.sqrt(2.0 / math.pi)
    return 0.5 * x * (1.0 + jnp.tanh(c * (x + 0.044715 * x * x * x)))


# --------------------------------- kernel ------------------------------------
# One grid step = one batch element (grid=(B,), "parallel" → megacore on v7x).

def block_kernel(x_ref,
                 ln1_w_ref, ln1_b_ref,
                 w_qkv_ref, b_qkv_ref,
                 w_aproj_ref, b_aproj_ref,
                 ln2_w_ref, ln2_b_ref,
                 w_fc_ref, b_fc_ref,
                 w_mproj_ref, b_mproj_ref,
                 o_ref,
                 *, n_head):
    T, C = x_ref.shape
    H = n_head
    hd = C // H

    x = x_ref[...]                                                   # (T, C) f32

    # ----------------- attention branch: x + attn(ln_1(x)) -----------------
    xn = _layernorm_f32(x, ln1_w_ref[...], ln1_b_ref[...])           # f32

    # Fused QKV projection: one wide GEMM, full MXU output width (3C).
    qkv = jnp.dot(xn.astype(jnp.bfloat16), w_qkv_ref[...],
                  preferred_element_type=jnp.float32) + b_qkv_ref[...]   # (T, 3C)

    # Split heads off the fused output (matches PyTorch view(T, H, hd).transpose).
    q = jnp.transpose(qkv[:, 0 * C:1 * C].reshape(T, H, hd), (1, 0, 2))  # (H, T, hd)
    k = jnp.transpose(qkv[:, 1 * C:2 * C].reshape(T, H, hd), (1, 0, 2))
    v = jnp.transpose(qkv[:, 2 * C:3 * C].reshape(T, H, hd), (1, 0, 2))

    # Scores for all heads of this batch element: (H, T, T), f32 accumulation.
    scale = 1.0 / math.sqrt(hd)
    s = jnp.einsum("hqd,hkd->hqk",
                   q.astype(jnp.bfloat16), k.astype(jnp.bfloat16),
                   preferred_element_type=jnp.float32) * scale

    # Plain causal mask — single iota comparison, no integer division.
    ri = lax.broadcasted_iota(jnp.int32, (T, T), 0)
    ci = lax.broadcasted_iota(jnp.int32, (T, T), 1)
    s = jnp.where((ri >= ci)[None, :, :], s, MASK_VALUE)

    # Softmax in f32; divide goes to the EUP via approx reciprocal.
    s_max = jnp.max(s, axis=-1, keepdims=True)
    e = jnp.exp(s - s_max)
    denom = jnp.sum(e, axis=-1, keepdims=True)
    p = e * pl.reciprocal(denom, approx=True)

    # PV, batched over heads: (H, T, hd).
    y = jnp.einsum("hqk,hkd->hqd",
                   p.astype(jnp.bfloat16), v.astype(jnp.bfloat16),
                   preferred_element_type=jnp.float32)

    # Merge heads back onto the lane axis (== PyTorch transpose(1,2).view(T, C)),
    # then a single full-width (T,C)@(C,C) output-projection GEMM.
    y = jnp.transpose(y, (1, 0, 2)).reshape(T, C)
    attn_out = jnp.dot(y.astype(jnp.bfloat16), w_aproj_ref[...],
                       preferred_element_type=jnp.float32) + b_aproj_ref[...]

    x1 = x + attn_out

    # -------------------- MLP branch: x1 + mlp(ln_2(x1)) --------------------
    x1n = _layernorm_f32(x1, ln2_w_ref[...], ln2_b_ref[...])
    h = jnp.dot(x1n.astype(jnp.bfloat16), w_fc_ref[...],
                preferred_element_type=jnp.float32) + b_fc_ref[...]
    h = _new_gelu(h)                                                 # f32 on VPU/EUP
    mlp_out = jnp.dot(h.astype(jnp.bfloat16), w_mproj_ref[...],
                      preferred_element_type=jnp.float32) + b_mproj_ref[...]

    o_ref[...] = (x1 + mlp_out).astype(o_ref.dtype)


# --------------------------------- wrapper ------------------------------------

def _vmem_limit_bytes():
    # ~0.75 x physical VMEM per generation (128 MiB v5e/v6e, 64 MiB v7x).
    try:
        return int(0.75 * pltpu.get_tpu_info().vmem_capacity_bytes)
    except Exception:
        return 48 * 1024 * 1024


def block_forward(x, params, *, n_head):
    B, T, C = x.shape
    assert C % n_head == 0
    H, hd = n_head, C // n_head
    N = B * T
    mxu_dtype = jnp.bfloat16

    # Weights pre-cast to bf16 host-side; biases / LN params stay f32.
    w_qkv = params["w_attn"].astype(mxu_dtype)        # (C, 3C)
    b_qkv = params["b_attn"].astype(jnp.float32)      # (1, 3C)
    w_aproj = params["w_aproj"].astype(mxu_dtype)     # (C, C)
    w_fc = params["w_fc"].astype(mxu_dtype)           # (C, 4C)
    w_mproj = params["w_mproj"].astype(mxu_dtype)     # (4C, C)

    # Advisory cost estimate so XLA schedules surrounding ops sensibly.
    gemm_flops = (2 * N * C * (3 * C)            # fused qkv projection
                  + 2 * B * H * T * T * hd * 2   # QK^T and PV (per-batch scores)
                  + 2 * N * C * C                # attention output projection
                  + 2 * N * C * (4 * C)          # mlp c_fc
                  + 2 * N * (4 * C) * C)         # mlp c_proj
    transcendentals = B * H * T * T + N * 4 * C + B * H * T   # exp + tanh + recip
    bytes_accessed = (2 * B * T * C * 4                        # x in + out (f32)
                      + (3 * C * C + C * C + 8 * C * C) * 2    # bf16 weights
                      + (3 * C + C + 4 * C + C + 4 * C) * 4)   # biases + LN params
    cost = pl.CostEstimate(flops=int(gemm_flops),
                           transcendentals=int(transcendentals),
                           bytes_accessed=int(bytes_accessed))

    kernel = functools.partial(block_kernel, n_head=n_head)

    def rep_spec(shape):
        # Weight / bias blocks: full extent, grid-invariant (no re-DMA across steps).
        return pl.BlockSpec(shape, lambda b: (0,) * len(shape))

    grid_spec = pltpu.PrefetchScalarGridSpec(
        num_scalar_prefetch=0,
        grid=(B,),
        in_specs=[
            pl.BlockSpec((None, T, C), lambda b: (b, 0, 0)),   # x: one batch element
            rep_spec((1, C)), rep_spec((1, C)),                # ln1 w, b
            rep_spec((C, 3 * C)), rep_spec((1, 3 * C)),        # fused qkv w, b
            rep_spec((C, C)), rep_spec((1, C)),                # attn proj w, b
            rep_spec((1, C)), rep_spec((1, C)),                # ln2 w, b
            rep_spec((C, 4 * C)), rep_spec((1, 4 * C)),        # mlp fc w, b
            rep_spec((4 * C, C)), rep_spec((1, C)),            # mlp proj w, b
        ],
        out_specs=pl.BlockSpec((None, T, C), lambda b: (b, 0, 0)),
    )

    return pl.pallas_call(
        kernel,
        out_shape=jax.ShapeDtypeStruct((B, T, C), x.dtype),
        grid_spec=grid_spec,
        compiler_params=pltpu.CompilerParams(
            dimension_semantics=("parallel",),          # batch → both TCs on v7x
            vmem_limit_bytes=_vmem_limit_bytes()),
        cost_estimate=cost,
    )(x,
      params["ln1_w"], params["ln1_b"],
      w_qkv, b_qkv,
      w_aproj, params["b_aproj"],
      params["ln2_w"], params["ln2_b"],
      w_fc, params["b_fc"],
      w_mproj, params["b_mproj"])


# ------------------------------ param init ------------------------------------

def init_params(key, n_embd):
    C = n_embd
    ks = jax.random.split(key, 4)

    def linear(k, fan_in, fan_out):
        kw, kb = jax.random.split(k)
        bound = 1.0 / math.sqrt(fan_in)
        # stored as (in, out) so the math is x @ W  (== PyTorch x @ W.T)
        w = jax.random.uniform(kw, (fan_in, fan_out), jnp.float32, -bound, bound)
        b = jax.random.uniform(kb, (1, fan_out), jnp.float32, -bound, bound)
        return w, b

    w_attn, b_attn = linear(ks[0], C, 3 * C)     # c_attn
    w_aproj, b_aproj = linear(ks[1], C, C)       # attn.c_proj
    w_fc, b_fc = linear(ks[2], C, 4 * C)         # mlp.c_fc
    w_mproj, b_mproj = linear(ks[3], 4 * C, C)   # mlp.c_proj

    return {
        "ln1_w": jnp.ones((1, C), jnp.float32),
        "ln1_b": jnp.zeros((1, C), jnp.float32),
        "w_attn": w_attn, "b_attn": b_attn,
        "w_aproj": w_aproj, "b_aproj": b_aproj,
        "ln2_w": jnp.ones((1, C), jnp.float32),
        "ln2_b": jnp.zeros((1, C), jnp.float32),
        "w_fc": w_fc, "b_fc": b_fc,
        "w_mproj": w_mproj, "b_mproj": b_mproj,
    }


# --------------------------- pure-JAX reference --------------------------------

def block_reference(x, params, *, n_head):
    B, T, C = x.shape
    hd = C // n_head

    def ln(z, w, b):
        mu = jnp.mean(z, axis=-1, keepdims=True)
        var = jnp.mean((z - mu) ** 2, axis=-1, keepdims=True)
        return (z - mu) / jnp.sqrt(var + 1e-5) * w[0] + b[0]

    xn = ln(x, params["ln1_w"], params["ln1_b"])
    qkv = xn @ params["w_attn"] + params["b_attn"][0]
    q, k, v = jnp.split(qkv, 3, axis=-1)
    q = q.reshape(B, T, n_head, hd).transpose(0, 2, 1, 3)
    k = k.reshape(B, T, n_head, hd).transpose(0, 2, 1, 3)
    v = v.reshape(B, T, n_head, hd).transpose(0, 2, 1, 3)
    att = jnp.einsum("bhtd,bhsd->bhts", q, k) / math.sqrt(hd)
    mask = jnp.tril(jnp.ones((T, T), bool))
    att = jnp.where(mask, att, -jnp.inf)
    att = jax.nn.softmax(att, axis=-1)
    y = jnp.einsum("bhts,bhsd->bhtd", att, v)
    y = y.transpose(0, 2, 1, 3).reshape(B, T, C)
    x1 = x + (y @ params["w_aproj"] + params["b_aproj"][0])

    x1n = ln(x1, params["ln2_w"], params["ln2_b"])
    h = x1n @ params["w_fc"] + params["b_fc"][0]
    h = 0.5 * h * (1.0 + jnp.tanh(math.sqrt(2.0 / math.pi) * (h + 0.044715 * h ** 3)))
    return x1 + (h @ params["w_mproj"] + params["b_mproj"][0])


# ----------------------------------- main --------------------------------------

if __name__ == "__main__":
    B, T, C, N_HEAD = 2, 8, 32, 4  # small shapes consistent with the module

    key = jax.random.PRNGKey(0)
    kx, kp = jax.random.split(key)
    x = jax.random.normal(kx, (B, T, C), jnp.float32)
    params = init_params(kp, C)

    out = block_forward(x, params, n_head=N_HEAD)
    out = jax.block_until_ready(out)

    ref = block_reference(x, params, n_head=N_HEAD)  # f32 reference
    assert out.shape == (B, T, C)
    # bf16 MXU operands + approx reciprocal => looser tolerance than a pure-f32 kernel.
    assert jnp.allclose(out, ref, atol=1e-1, rtol=1e-1)

    print("KERNEL_OK")
</pallas_src>

<mosaic_0001>
module attributes {stable_mosaic.version = 11 : i64} {
  func.func @block_kernel(%arg0: i32, %arg1: memref<1x8x32xf32, #tpu.memory_space<vmem>>, %arg2: memref<1x32xf32, #tpu.memory_space<vmem>>, %arg3: memref<1x32xf32, #tpu.memory_space<vmem>>, %arg4: memref<32x96xbf16, #tpu.memory_space<vmem>>, %arg5: memref<1x96xf32, #tpu.memory_space<vmem>>, %arg6: memref<32x32xbf16, #tpu.memory_space<vmem>>, %arg7: memref<1x32xf32, #tpu.memory_space<vmem>>, %arg8: memref<1x32xf32, #tpu.memory_space<vmem>>, %arg9: memref<1x32xf32, #tpu.memory_space<vmem>>, %arg10: memref<32x128xbf16, #tpu.memory_space<vmem>>, %arg11: memref<1x128xf32, #tpu.memory_space<vmem>>, %arg12: memref<128x32xbf16, #tpu.memory_space<vmem>>, %arg13: memref<1x32xf32, #tpu.memory_space<vmem>>, %arg14: memref<1x8x32xf32, #tpu.memory_space<vmem>>) attributes {dimension_semantics = [#tpu.dimension_semantics<parallel>], iteration_bounds = array<i64: 2>, scalar_prefetch = 0 : i64, scratch_operands = 0 : i64, tpu.core_type = #tpu.core_type<tc>, window_params = [{transform_indices = @transform_0, window_bounds = array<i64: 1, 8, 32>}, {pipeline_mode = #tpu.pipeline_mode<synchronous>, transform_indices = @transform_1, window_bounds = array<i64: 1, 32>}, {pipeline_mode = #tpu.pipeline_mode<synchronous>, transform_indices = @transform_2, window_bounds = array<i64: 1, 32>}, {pipeline_mode = #tpu.pipeline_mode<synchronous>, transform_indices = @transform_3, window_bounds = array<i64: 32, 96>}, {pipeline_mode = #tpu.pipeline_mode<synchronous>, transform_indices = @transform_4, window_bounds = array<i64: 1, 96>}, {pipeline_mode = #tpu.pipeline_mode<synchronous>, transform_indices = @transform_5, window_bounds = array<i64: 32, 32>}, {pipeline_mode = #tpu.pipeline_mode<synchronous>, transform_indices = @transform_6, window_bounds = array<i64: 1, 32>}, {pipeline_mode = #tpu.pipeline_mode<synchronous>, transform_indices = @transform_7, window_bounds = array<i64: 1, 32>}, {pipeline_mode = #tpu.pipeline_mode<synchronous>, transform_indices = @transform_8, window_bounds = array<i64: 1, 32>}, {pipeline_mode = #tpu.pipeline_mode<synchronous>, transform_indices = @transform_9, window_bounds = array<i64: 32, 128>}, {pipeline_mode = #tpu.pipeline_mode<synchronous>, transform_indices = @transform_10, window_bounds = array<i64: 1, 128>}, {pipeline_mode = #tpu.pipeline_mode<synchronous>, transform_indices = @transform_11, window_bounds = array<i64: 128, 32>}, {pipeline_mode = #tpu.pipeline_mode<synchronous>, transform_indices = @transform_12, window_bounds = array<i64: 1, 32>}, {transform_indices = @transform_13, window_bounds = array<i64: 1, 8, 32>}]} {
    %c0 = arith.constant 0 : index
    %c0_0 = arith.constant 0 : index
    %c0_1 = arith.constant 0 : index
    %0 = vector.load %arg1[%c0, %c0_0, %c0_1] : memref<1x8x32xf32, #tpu.memory_space<vmem>>, vector<1x8x32xf32>
    %1 = vector.shape_cast %0 : vector<1x8x32xf32> to vector<8x32xf32>
    %c0_2 = arith.constant 0 : index
    %c0_3 = arith.constant 0 : index
    %2 = vector.load %arg2[%c0_2, %c0_3] : memref<1x32xf32, #tpu.memory_space<vmem>>, vector<1x32xf32>
    %c0_4 = arith.constant 0 : index
    %c0_5 = arith.constant 0 : index
    %3 = vector.load %arg3[%c0_4, %c0_5] : memref<1x32xf32, #tpu.memory_space<vmem>>, vector<1x32xf32>
    %cst = arith.constant dense<0.000000e+00> : vector<8xf32>
    %4 = vector.multi_reduction <add>, %1, %cst [1] : vector<8x32xf32> to vector<8xf32>
    %5 = vector.shape_cast %4 : vector<8xf32> to vector<8x1xf32>
    %cst_6 = arith.constant 3.200000e+01 : f32
    %6 = vector.broadcast %cst_6 : f32 to vector<8x1xf32>
    %7 = arith.divf %5, %6 : vector<8x1xf32>
    %8 = vector.broadcast %7 : vector<8x1xf32> to vector<8x32xf32>
    %9 = arith.subf %1, %8 : vector<8x32xf32>
    %10 = arith.mulf %9, %9 : vector<8x32xf32>
    %cst_7 = arith.constant dense<0.000000e+00> : vector<8xf32>
    %11 = vector.multi_reduction <add>, %10, %cst_7 [1] : vector<8x32xf32> to vector<8xf32>
    %12 = vector.shape_cast %11 : vector<8xf32> to vector<8x1xf32>
    %cst_8 = arith.constant 3.200000e+01 : f32
    %13 = vector.broadcast %cst_8 : f32 to vector<8x1xf32>
    %14 = arith.divf %12, %13 : vector<8x1xf32>
    %15 = vector.broadcast %7 : vector<8x1xf32> to vector<8x32xf32>
    %16 = arith.subf %1, %15 : vector<8x32xf32>
    %cst_9 = arith.constant 9.99999974E-6 : f32
    %17 = vector.broadcast %cst_9 : f32 to vector<8x1xf32>
    %18 = arith.addf %14, %17 : vector<8x1xf32>
    %19 = math.rsqrt %18 : vector<8x1xf32>
    %20 = vector.broadcast %19 : vector<8x1xf32> to vector<8x32xf32>
    %21 = arith.mulf %16, %20 : vector<8x32xf32>
    %22 = vector.broadcast %2 : vector<1x32xf32> to vector<8x32xf32>
    %23 = arith.mulf %21, %22 : vector<8x32xf32>
    %24 = vector.broadcast %3 : vector<1x32xf32> to vector<8x32xf32>
    %25 = arith.addf %23, %24 : vector<8x32xf32>
    %26 = arith.truncf %25 : vector<8x32xf32> to vector<8x32xbf16>
    %c0_10 = arith.constant 0 : index
    %c0_11 = arith.constant 0 : index
    %27 = vector.load %arg4[%c0_10, %c0_11] : memref<32x96xbf16, #tpu.memory_space<vmem>>, vector<32x96xbf16>
    %cst_12 = arith.constant dense<0.000000e+00> : vector<8x96xf32>
    %28 = tpu.matmul %26, %27, %cst_12 {dimension_numbers = #tpu.dot_dimension_numbers<[1], [0], [0], [1], [0, 0, 1, 1], [], []>} : vector<8x32xbf16>, vector<32x96xbf16>, vector<8x96xf32> -> vector<8x96xf32>
    %c0_13 = arith.constant 0 : index
    %c0_14 = arith.constant 0 : index
    %29 = vector.load %arg5[%c0_13, %c0_14] : memref<1x96xf32, #tpu.memory_space<vmem>>, vector<1x96xf32>
    %30 = vector.broadcast %29 : vector<1x96xf32> to vector<8x96xf32>
    %31 = arith.addf %28, %30 : vector<8x96xf32>
    %32 = vector.extract_strided_slice %31 {offsets = [0, 0], sizes = [8, 32], strides = [1, 1]} : vector<8x96xf32> to vector<8x32xf32>
    %33 = vector.shape_cast %32 : vector<8x32xf32> to vector<8x4x8xf32>
    %34 = tpu.transpose %33, [1, 0, 2] : vector<8x4x8xf32> -> vector<4x8x8xf32>
    %35 = vector.extract_strided_slice %31 {offsets = [0, 32], sizes = [8, 32], strides = [1, 1]} : vector<8x96xf32> to vector<8x32xf32>
    %36 = vector.shape_cast %35 : vector<8x32xf32> to vector<8x4x8xf32>
    %37 = tpu.transpose %36, [1, 0, 2] : vector<8x4x8xf32> -> vector<4x8x8xf32>
    %38 = vector.extract_strided_slice %31 {offsets = [0, 64], sizes = [8, 32], strides = [1, 1]} : vector<8x96xf32> to vector<8x32xf32>
    %39 = vector.shape_cast %38 : vector<8x32xf32> to vector<8x4x8xf32>
    %40 = tpu.transpose %39, [1, 0, 2] : vector<8x4x8xf32> -> vector<4x8x8xf32>
    %41 = arith.truncf %34 : vector<4x8x8xf32> to vector<4x8x8xbf16>
    %42 = arith.truncf %37 : vector<4x8x8xf32> to vector<4x8x8xbf16>
    "tpu.trace_start"() <{level = 10 : i32, message = "hqd,hkd->hqk"}> : () -> ()
    %cst_15 = arith.constant dense<0.000000e+00> : vector<4x8x8xf32>
    %43 = tpu.matmul %41, %42, %cst_15 {dimension_numbers = #tpu.dot_dimension_numbers<[2], [2], [1], [1], [0, 0, 0, 1, 1, 1], [0], [0]>} : vector<4x8x8xbf16>, vector<4x8x8xbf16>, vector<4x8x8xf32> -> vector<4x8x8xf32>
    "tpu.trace_stop"() : () -> ()
    %cst_16 = arith.constant 0.353553385 : f32
    %44 = vector.broadcast %cst_16 : f32 to vector<4x8x8xf32>
    %45 = arith.mulf %43, %44 : vector<4x8x8xf32>
    %46 = tpu.iota {dimensions = array<i32: 0>} : vector<8x8xi32>
    %47 = tpu.iota {dimensions = array<i32: 1>} : vector<8x8xi32>
    %48 = arith.cmpi sge, %46, %47 : vector<8x8xi32>
    %49 = vector.shape_cast %48 : vector<8x8xi1> to vector<1x8x8xi1>
    %cst_17 = arith.constant -1.000000e+30 : f32
    %50 = vector.shape_cast %49 : vector<1x8x8xi1> to vector<1x8x8xi1>
    %51 = vector.broadcast %50 : vector<1x8x8xi1> to vector<4x8x8xi1>
    %52 = vector.broadcast %cst_17 : f32 to vector<4x8x8xf32>
    %53 = arith.select %51, %45, %52 : vector<4x8x8xi1>, vector<4x8x8xf32>
    %cst_18 = arith.constant dense<0xFF800000> : vector<4x8xf32>
    %54 = vector.multi_reduction <maximumf>, %53, %cst_18 [2] : vector<4x8x8xf32> to vector<4x8xf32>
    %55 = vector.shape_cast %54 : vector<4x8xf32> to vector<4x8x1xf32>
    %56 = vector.broadcast %55 : vector<4x8x1xf32> to vector<4x8x8xf32>
    %57 = arith.subf %53, %56 : vector<4x8x8xf32>
    %58 = math.exp %57 : vector<4x8x8xf32>
    %cst_19 = arith.constant dense<0.000000e+00> : vector<4x8xf32>
    %59 = vector.multi_reduction <add>, %58, %cst_19 [2] : vector<4x8x8xf32> to vector<4x8xf32>
    %60 = vector.shape_cast %59 : vector<4x8xf32> to vector<4x8x1xf32>
    %61 = tpu.reciprocal %60 {approx = true} : vector<4x8x1xf32> -> vector<4x8x1xf32>
    %62 = vector.broadcast %61 : vector<4x8x1xf32> to vector<4x8x8xf32>
    %63 = arith.mulf %58, %62 : vector<4x8x8xf32>
    %64 = arith.truncf %63 : vector<4x8x8xf32> to vector<4x8x8xbf16>
    %65 = arith.truncf %40 : vector<4x8x8xf32> to vector<4x8x8xbf16>
    "tpu.trace_start"() <{level = 10 : i32, message = "hqk,hkd->hqd"}> : () -> ()
    %cst_20 = arith.constant dense<0.000000e+00> : vector<4x8x8xf32>
    %66 = tpu.matmul %64, %65, %cst_20 {dimension_numbers = #tpu.dot_dimension_numbers<[2], [1], [1], [2], [0, 0, 0, 1, 1, 2], [0], [0]>} : vector<4x8x8xbf16>, vector<4x8x8xbf16>, vector<4x8x8xf32> -> vector<4x8x8xf32>
    "tpu.trace_stop"() : () -> ()
    %67 = tpu.transpose %66, [1, 0, 2] : vector<4x8x8xf32> -> vector<8x4x8xf32>
    %68 = vector.shape_cast %67 : vector<8x4x8xf32> to vector<8x32xf32>
    %69 = arith.truncf %68 : vector<8x32xf32> to vector<8x32xbf16>
    %c0_21 = arith.constant 0 : index
    %c0_22 = arith.constant 0 : index
    %70 = vector.load %arg6[%c0_21, %c0_22] : memref<32x32xbf16, #tpu.memory_space<vmem>>, vector<32x32xbf16>
    %cst_23 = arith.constant dense<0.000000e+00> : vector<8x32xf32>
    %71 = tpu.matmul %69, %70, %cst_23 {dimension_numbers = #tpu.dot_dimension_numbers<[1], [0], [0], [1], [0, 0, 1, 1], [], []>} : vector<8x32xbf16>, vector<32x32xbf16>, vector<8x32xf32> -> vector<8x32xf32>
    %c0_24 = arith.constant 0 : index
    %c0_25 = arith.constant 0 : index
    %72 = vector.load %arg7[%c0_24, %c0_25] : memref<1x32xf32, #tpu.memory_space<vmem>>, vector<1x32xf32>
    %73 = vector.broadcast %72 : vector<1x32xf32> to vector<8x32xf32>
    %74 = arith.addf %71, %73 : vector<8x32xf32>
    %75 = arith.addf %1, %74 : vector<8x32xf32>
    %c0_26 = arith.constant 0 : index
    %c0_27 = arith.constant 0 : index
    %76 = vector.load %arg8[%c0_26, %c0_27] : memref<1x32xf32, #tpu.memory_space<vmem>>, vector<1x32xf32>
    %c0_28 = arith.constant 0 : index
    %c0_29 = arith.constant 0 : index
    %77 = vector.load %arg9[%c0_28, %c0_29] : memref<1x32xf32, #tpu.memory_space<vmem>>, vector<1x32xf32>
    %cst_30 = arith.constant dense<0.000000e+00> : vector<8xf32>
    %78 = vector.multi_reduction <add>, %75, %cst_30 [1] : vector<8x32xf32> to vector<8xf32>
    %79 = vector.shape_cast %78 : vector<8xf32> to vector<8x1xf32>
    %cst_31 = arith.constant 3.200000e+01 : f32
    %80 = vector.broadcast %cst_31 : f32 to vector<8x1xf32>
    %81 = arith.divf %79, %80 : vector<8x1xf32>
    %82 = vector.broadcast %81 : vector<8x1xf32> to vector<8x32xf32>
    %83 = arith.subf %75, %82 : vector<8x32xf32>
    %84 = arith.mulf %83, %83 : vector<8x32xf32>
    %cst_32 = arith.constant dense<0.000000e+00> : vector<8xf32>
    %85 = vector.multi_reduction <add>, %84, %cst_32 [1] : vector<8x32xf32> to vector<8xf32>
    %86 = vector.shape_cast %85 : vector<8xf32> to vector<8x1xf32>
    %cst_33 = arith.constant 3.200000e+01 : f32
    %87 = vector.broadcast %cst_33 : f32 to vector<8x1xf32>
    %88 = arith.divf %86, %87 : vector<8x1xf32>
    %89 = vector.broadcast %81 : vector<8x1xf32> to vector<8x32xf32>
    %90 = arith.subf %75, %89 : vector<8x32xf32>
    %cst_34 = arith.constant 9.99999974E-6 : f32
    %91 = vector.broadcast %cst_34 : f32 to vector<8x1xf32>
    %92 = arith.addf %88, %91 : vector<8x1xf32>
    %93 = math.rsqrt %92 : vector<8x1xf32>
    %94 = vector.broadcast %93 : vector<8x1xf32> to vector<8x32xf32>
    %95 = arith.mulf %90, %94 : vector<8x32xf32>
    %96 = vector.broadcast %76 : vector<1x32xf32> to vector<8x32xf32>
    %97 = arith.mulf %95, %96 : vector<8x32xf32>
    %98 = vector.broadcast %77 : vector<1x32xf32> to vector<8x32xf32>
    %99 = arith.addf %97, %98 : vector<8x32xf32>
    %100 = arith.truncf %99 : vector<8x32xf32> to vector<8x32xbf16>
    %c0_35 = arith.constant 0 : index
    %c0_36 = arith.constant 0 : index
    %101 = vector.load %arg10[%c0_35, %c0_36] : memref<32x128xbf16, #tpu.memory_space<vmem>>, vector<32x128xbf16>
    %cst_37 = arith.constant dense<0.000000e+00> : vector<8x128xf32>
    %102 = tpu.matmul %100, %101, %cst_37 {dimension_numbers = #tpu.dot_dimension_numbers<[1], [0], [0], [1], [0, 0, 1, 1], [], []>} : vector<8x32xbf16>, vector<32x128xbf16>, vector<8x128xf32> -> vector<8x128xf32>
    %c0_38 = arith.constant 0 : index
    %c0_39 = arith.constant 0 : index
    %103 = vector.load %arg11[%c0_38, %c0_39] : memref<1x128xf32, #tpu.memory_space<vmem>>, vector<1x128xf32>
    %104 = vector.broadcast %103 : vector<1x128xf32> to vector<8x128xf32>
    %105 = arith.addf %102, %104 : vector<8x128xf32>
    %cst_40 = arith.constant 5.000000e-01 : f32
    %106 = vector.broadcast %cst_40 : f32 to vector<8x128xf32>
    %107 = arith.mulf %106, %105 : vector<8x128xf32>
    %cst_41 = arith.constant 4.471500e-02 : f32
    %108 = vector.broadcast %cst_41 : f32 to vector<8x128xf32>
    %109 = arith.mulf %108, %105 : vector<8x128xf32>
    %110 = arith.mulf %109, %105 : vector<8x128xf32>
    %111 = arith.mulf %110, %105 : vector<8x128xf32>
    %112 = arith.addf %105, %111 : vector<8x128xf32>
    %cst_42 = arith.constant 0.797884583 : f32
    %113 = vector.broadcast %cst_42 : f32 to vector<8x128xf32>
    %114 = arith.mulf %113, %112 : vector<8x128xf32>
    %115 = math.tanh %114 : vector<8x128xf32>
    %cst_43 = arith.constant 1.000000e+00 : f32
    %116 = vector.broadcast %cst_43 : f32 to vector<8x128xf32>
    %117 = arith.addf %116, %115 : vector<8x128xf32>
    %118 = arith.mulf %107, %117 : vector<8x128xf32>
    %119 = arith.truncf %118 : vector<8x128xf32> to vector<8x128xbf16>
    %c0_44 = arith.constant 0 : index
    %c0_45 = arith.constant 0 : index
    %120 = vector.load %arg12[%c0_44, %c0_45] : memref<128x32xbf16, #tpu.memory_space<vmem>>, vector<128x32xbf16>
    %cst_46 = arith.constant dense<0.000000e+00> : vector<8x32xf32>
    %121 = tpu.matmul %119, %120, %cst_46 {dimension_numbers = #tpu.dot_dimension_numbers<[1], [0], [0], [1], [0, 0, 1, 1], [], []>} : vector<8x128xbf16>, vector<128x32xbf16>, vector<8x32xf32> -> vector<8x32xf32>
    %c0_47 = arith.constant 0 : index
    %c0_48 = arith.constant 0 : index
    %122 = vector.load %arg13[%c0_47, %c0_48] : memref<1x32xf32, #tpu.memory_space<vmem>>, vector<1x32xf32>
    %123 = vector.broadcast %122 : vector<1x32xf32> to vector<8x32xf32>
    %124 = arith.addf %121, %123 : vector<8x32xf32>
    %125 = arith.addf %75, %124 : vector<8x32xf32>
    %c0_49 = arith.constant 0 : index
    %c0_50 = arith.constant 0 : index
    %c0_51 = arith.constant 0 : index
    %126 = vector.load %arg14[%c0_49, %c0_50, %c0_51] : memref<1x8x32xf32, #tpu.memory_space<vmem>>, vector<1x8x32xf32>
    %127 = vector.shape_cast %126 : vector<1x8x32xf32> to vector<8x32xf32>
    %128 = vector.shape_cast %125 : vector<8x32xf32> to vector<1x8x32xf32>
    tpu.vector_store %arg14[%c0_49, %c0_50, %c0_51], %128 {strides = array<i32>} : memref<1x8x32xf32, #tpu.memory_space<vmem>>, vector<1x8x32xf32>,
    return
  }
  func.func @transform_0(%arg0: i32) -> (i32, i32, i32) {
    %c0_i32 = arith.constant 0 : i32
    %c0_i32_0 = arith.constant 0 : i32
    %c0_i32_1 = arith.constant 0 : i32
    return %arg0, %c0_i32, %c0_i32_0 : i32, i32, i32
  }
  func.func @transform_1(%arg0: i32) -> (i32, i32) {
    %c0_i32 = arith.constant 0 : i32
    %c0_i32_0 = arith.constant 0 : i32
    %c0_i32_1 = arith.constant 0 : i32
    return %c0_i32, %c0_i32_0 : i32, i32
  }
  func.func @transform_2(%arg0: i32) -> (i32, i32) {
    %c0_i32 = arith.constant 0 : i32
    %c0_i32_0 = arith.constant 0 : i32
    %c0_i32_1 = arith.constant 0 : i32
    return %c0_i32, %c0_i32_0 : i32, i32
  }
  func.func @transform_3(%arg0: i32) -> (i32, i32) {
    %c0_i32 = arith.constant 0 : i32
    %c0_i32_0 = arith.constant 0 : i32
    %c0_i32_1 = arith.constant 0 : i32
    return %c0_i32, %c0_i32_0 : i32, i32
  }
  func.func @transform_4(%arg0: i32) -> (i32, i32) {
    %c0_i32 = arith.constant 0 : i32
    %c0_i32_0 = arith.constant 0 : i32
    %c0_i32_1 = arith.constant 0 : i32
    return %c0_i32, %c0_i32_0 : i32, i32
  }
  func.func @transform_5(%arg0: i32) -> (i32, i32) {
    %c0_i32 = arith.constant 0 : i32
    %c0_i32_0 = arith.constant 0 : i32
    %c0_i32_1 = arith.constant 0 : i32
    return %c0_i32, %c0_i32_0 : i32, i32
  }
  func.func @transform_6(%arg0: i32) -> (i32, i32) {
    %c0_i32 = arith.constant 0 : i32
    %c0_i32_0 = arith.constant 0 : i32
    %c0_i32_1 = arith.constant 0 : i32
    return %c0_i32, %c0_i32_0 : i32, i32
  }
  func.func @transform_7(%arg0: i32) -> (i32, i32) {
    %c0_i32 = arith.constant 0 : i32
    %c0_i32_0 = arith.constant 0 : i32
    %c0_i32_1 = arith.constant 0 : i32
    return %c0_i32, %c0_i32_0 : i32, i32
  }
  func.func @transform_8(%arg0: i32) -> (i32, i32) {
    %c0_i32 = arith.constant 0 : i32
    %c0_i32_0 = arith.constant 0 : i32
    %c0_i32_1 = arith.constant 0 : i32
    return %c0_i32, %c0_i32_0 : i32, i32
  }
  func.func @transform_9(%arg0: i32) -> (i32, i32) {
    %c0_i32 = arith.constant 0 : i32
    %c0_i32_0 = arith.constant 0 : i32
    %c0_i32_1 = arith.constant 0 : i32
    return %c0_i32, %c0_i32_0 : i32, i32
  }
  func.func @transform_10(%arg0: i32) -> (i32, i32) {
    %c0_i32 = arith.constant 0 : i32
    %c0_i32_0 = arith.constant 0 : i32
    %c0_i32_1 = arith.constant 0 : i32
    return %c0_i32, %c0_i32_0 : i32, i32
  }
  func.func @transform_11(%arg0: i32) -> (i32, i32) {
    %c0_i32 = arith.constant 0 : i32
    %c0_i32_0 = arith.constant 0 : i32
    %c0_i32_1 = arith.constant 0 : i32
    return %c0_i32, %c0_i32_0 : i32, i32
  }
  func.func @transform_12(%arg0: i32) -> (i32, i32) {
    %c0_i32 = arith.constant 0 : i32
    %c0_i32_0 = arith.constant 0 : i32
    %c0_i32_1 = arith.constant 0 : i32
    return %c0_i32, %c0_i32_0 : i32, i32
  }
  func.func @transform_13(%arg0: i32) -> (i32, i32, i32) {
    %c0_i32 = arith.constant 0 : i32
    %c0_i32_0 = arith.constant 0 : i32
    %c0_i32_1 = arith.constant 0 : i32
    return %arg0, %c0_i32, %c0_i32_0 : i32, i32, i32
  }
}

</mosaic_0001>

<bundles_post_ra>
// kernel: tpu_custom_call.1
= control target key start
LH: loop header
LB: loop body
LE: loop exit
PB: predicated region body
PF: predicated region fallthrough
CT: control target
= control target key end

     0   :  { %s2728_s0 = inlined_call_operand.vmem [shape: f32[2,8,32], index: 0, kind: input, shape index: {}]   ;;  %s2729_s1 = inlined_call_operand.vmem [shape: f32[1,32], index: 1, kind: input, shape index: {}]   ;;  %s2730_s2 = inlined_call_operand.vmem [shape: f32[1,32], index: 2, kind: input, shape index: {}]   ;;  %s2731_s3 = inlined_call_operand.vmem [shape: bf16[32,96], index: 3, kind: input, shape index: {}]   ;;  %s2732_s4 = inlined_call_operand.vmem [shape: f32[1,96], index: 4, kind: input, shape index: {}]   ;;  %s2733_s5 = inlined_call_operand.vmem [shape: bf16[32,32], index: 5, kind: input, shape index: {}]   ;;  %s2734_s6 = inlined_call_operand.vmem [shape: f32[1,32], index: 6, kind: input, shape index: {}]   ;;  %s2735_s7 = inlined_call_operand.vmem [shape: f32[1,32], index: 7, kind: input, shape index: {}]   ;;  %s2736_s8 = inlined_call_operand.vmem [shape: f32[1,32], index: 8, kind: input, shape index: {}]   ;;  %s2737_s9 = inlined_call_operand.vmem [shape: bf16[32,128], index: 9, kind: input, shape index: {}]   ;;  %s2738_s10 = inlined_call_operand.vmem [shape: f32[1,128], index: 10, kind: input, shape index: {}]   ;;  %s2739_s11 = inlined_call_operand.vmem [shape: bf16[128,32], index: 11, kind: input, shape index: {}]   ;;  %s2740_s12 = inlined_call_operand.vmem [shape: f32[1,32], index: 12, kind: input, shape index: {}]   ;;  %s2741_s13 = inlined_call_operand.hbm [shape: f32[2,8,32], index: 13, kind: output, shape index: {}]  }
   0x1   :  { %2742 = sst [smem:[#allocation5_spill]] %s2728_s0 }
   0x2   :  { %2743 = sst [smem:[#allocation6_spill]] %s2729_s1 }
   0x3   :  { %2744 = sst [smem:[#allocation7_spill]] %s2730_s2 }
   0x4   :  { %18 = vsyncpa [#allocation3], 0 }
   0x5   :  { %20 = vsyncpa [#allocation3 + $0x1], 0  ;;  %s2347_s25 = smov 0   ;;  %s2349_s26 = smov 0  }
   0x6   :  { %s2351_s27 = smov 0   ;;  %s2353_s28 = smov 0  }
   0x7 LB: > { %s2368_s29 = sadd.s32 4294967295, %s2262_s28   ;;  %s1936_s30 = sadd.s32 4294967294, %s2262_s28   ;;  %s2262_s28 = sphi %s2353_s28, %s2753_s28   ;;  %s2258_s27 = sphi %s2351_s27, %s2752_s27   ;;  %s2254_s26 = sphi %s2349_s26, %s2751_s26   ;;  %s2250_s25 = sphi %s2347_s25, %s2750_s25  }
   0x8   : > { %s2372_s14 = sadd.s32 1, %s2262_s28   ;;  %s311_s15 = sadd.s32 1, %s2258_s27 }
   0x9   : > { %s308_s16 = ssub.s32 %s2262_s28, %s2372_s14  ;;  %p321_p0 = scmp.ne.s32.totalorder %s2258_s27, %s2254_s26 }
   0xa   : > { %p309_p1 = scmp.eq.s32.totalorder %s308_s16, 0  ;;  %p322_p2 = scmp.eq.s32.totalorder %s2368_s29, 1 }
   0xb   : > { %p327_p3 = scmp.ne.s32.totalorder %s2254_s26, %s2250_s25  ;;  %p328_p4 = scmp.eq.s32.totalorder %s1936_s30, 1 }
   0xc   : > { %s2383_s17 = scalar_select %p309_p1, %s2258_s27, %s311_s15  }
   0xd   : > { %p2385_p5 = por %p322_p2, %p321_p0  ;;  %p2389_p6 = por %p328_p4, %p327_p3 }
   0xe   : > { %p1939_p7 = scmp.ge.s32.totalorder %s2262_s28, 1  ;;  %p389_p8 = scmp.lt.s32.totalorder %s2262_s28, 3 }
  0x10   : > { %p390_p9 = pnand %p1939_p7, %p389_p8 }
  0x11   : > { %p432_p10 = scmp.lt.s32.totalorder (!%p390_p9), %s2368_s29, 1  ;;  %vm440_vm0 = vcmask (!%p390_p9), 261120   ;;  %s2747_s0 = sld [smem:[#allocation5_spill]] (!%p390_p9)  ;;  %v2164_v7 = vld [vmem:[%s2731_s3] sm:$0xff] (!%p390_p9)   ;;  %v2264_v8 = vmov (!%p390_p9), 0.0   ;;  %vm2265_vm1 = vmmov (!%p390_p9), 0   ;;  %v551_v31 = vlaneseq (!%p390_p9) }
  0x12   : > { %393 = sbr.rel (%p390_p9) target bundleno = 2771 (0xad3), region = 72  ;;  %2021 = vmatprep.subr.bf16.mxu0 (!%p390_p9), %v2264_v8  ;;  %2025 = vmatprep.mubr.msk.bf16.mxu0 (!%p390_p9), %vm2265_vm1, %v2264_v8  ;;  %v2165_v9 = vld [vmem:[%s2731_s3 + $0x8] sm:$0xff] (!%p390_p9)   ;;  %s2748_s1 = sld [smem:[#allocation6_spill]] (!%p390_p9)  ;;  %v1944_v20 = vld [vmem:[%s2732_s4] ss:$0 sm:$0xff] (!%p390_p9)  ;;  %vm986_vm2 = vcmask (!%p390_p9), 64512  }
  0x13   : > { %2022 = vmatpush3.bf16.msra.mxu0 (!%p390_p9), %v2164_v7  ;;  %2041 = vmatprep.subr.bf16.mxu1 (!%p390_p9), %v2264_v8  ;;  %s2749_s2 = sld [smem:[#allocation7_spill]] (!%p390_p9)  ;;  %s2266_s16 = smov (!%p390_p9), 104   ;;  %v2270_v29 = vmov (!%p390_p9), 1983009808   ;;  %v2448_v33 = vshrl.u32 (!%p390_p9), %v551_v31, 7  ;;  %vm1241_vm4 = vcmask (!%p390_p9), 1043456  }
  0x14   : > { %2023 = vmatprep.subr.bf16.mxu0 (!%p390_p9), %v2264_v8  ;;  %2043 = vmatprep.mubr.msk.bf16.mxu1 (!%p390_p9), %vm2265_vm1, %v2264_v8  ;;  %s2269_s22 = smov (!%p390_p9), 96   ;;  %v549_v30 = vunpack.c.l.s4 (!%p390_p9), %v2270_v29  ;;  %v2271_v35 = vmov (!%p390_p9), 1934713408   ;;  %s2272_s23 = smov (!%p390_p9), 64   ;;  %vm1572_vm5 = vcmask (!%p390_p9), 130048   ;;  %vm1574_vm6 = vcmask (!%p390_p9), 195584  }
  0x15   : > { %v581_v36 = vunpack.c.l.s4 (!%p390_p9), %v2271_v35 }
  0x16   : > { %v550_v32 = vunpack.c.0.s8 (!%p390_p9), %v549_v30 }
  0x17   : > { %2024 = vmatpush3.bf16.msra.mxu0 (!%p390_p9), %v2165_v9  ;;  %v582_v43 = vunpack.c.0.s8 (!%p390_p9), %v581_v36 }
  0x18   : > { %2029 = vmatprep.subr.bf16.mxu0 (!%p390_p9), %v2264_v8  ;;  %v1942_v14 = vld [vmem:[%s2748_s1] ss:$0 sm:$0xff] (!%p390_p9)  ;;  %v2455_v39 = vsub.s32 (!%p390_p9), %v550_v32, %v2448_v33 }
  0x19   : > { %s433_s20 = scalar_select %p432_p10, %s2368_s29, 1  ;;  %v1943_v16 = vld [vmem:[%s2749_s2] ss:$0 sm:$0xff]  ;;  %v2466_v49 = vsub.s32 %v582_v43, %v2448_v33 }
  0x1b   : > { %s1941_s21 = sshll.u32 %s433_s20, 3  ;;  %s2267_s20 = smov 120  }
  0x1c   : > { %s435_s24 = scalar_lea.vmem %s2747_s0, %s1941_s21  ;;  %s2268_s21 = smov 112  }
  0x1d   : > { %v2400_v0 = vld [vmem:[%s435_s24] sm:$0xff] }
  0x1e   : > { %v441_v1 = vsel %vm440_vm0, %v2400_v0, 0.0 }
  0x1f   : > { %442 = vadd.xlane.f32.xlu0 %v441_v1 }
  0xac   : > { %v443_v2 = vpop.xlane.xlu0 %442 }
  0xad   : > { %v445_v3 = vmul.f32 0.03125, %v443_v2 }
  0xaf   : > { %v446_v4 = vsub.f32 %v2400_v0, %v445_v3 }
  0xb1   : > { %v447_v5 = vmul.f32 %v446_v4, %v446_v4 }
  0xb3   : > { %v448_v6 = vsel %vm440_vm0, %v447_v5, 0.0 }
  0xb4   : > { %449 = vadd.xlane.f32.xlu0 %v448_v6 }
 0x141   : > { %v450_v10 = vpop.xlane.xlu0 %449 }
 0x142   : > { %v451_v11 = vmul.f32 0.03125, %v450_v10 }
 0x144   : > { %v452_v12 = vadd.f32 1e-05, %v451_v11 }
 0x146   : > { %2178 = vrsqrt.f32 %v452_v12 }
 0x150   : > { %v2179_v13 = vpop.eup %2178 }
 0x151   : > { %v454_v15 = vmul.f32 %v2179_v13, %v446_v4 }
 0x153   : > { %v461_v17 = vmul.f32 %v1942_v14, %v454_v15 }
 0x155   : > { %v468_v18 = vadd.f32 %v1943_v16, %v461_v17 }
 0x157   : > { %v469_v19 = vpack.c.bf16 %v468_v18, %v468_v18 }
 0x159   : > { %2026 = vmatmul.mubr.msk.bf16.vlgmr.msra.gmra.mrb[0].mxu0 %vm440_vm0, %v469_v19 }
 0x15a   : > { %2031 = vmatprep.mubr.msk.bf16.mxu0 %vm2265_vm1, %v2264_v8 }
 0x22c   : > { %v530_v21 = vpop.f32.mrb[0].mxu0 }
 0x22d   : > { %v2432_v22 = vadd.f32 %v1944_v20, %v530_v21  ;;  %v2027_v23 = vpop.f32.mrb[1].mxu0 }
 0x22e   : > { %v533_v24 = vpop.f32.mrb[2].mxu0 }
 0x22f   : > { %543 = vrot.lane.b32.xlu0 %v2432_v22, %s2266_s16  ;;  %537 = vrot.lane.b32.xlu1 %v2432_v22, %s2267_s20  ;;  %v2028_v25 = vpop.f32.mrb[3].mxu0  ;;  %s2273_s20 = smov 16   ;;  %s429_s16 = sand.u32 1, %s2254_s26  }
 0x233   : > { %540 = vrot.lane.b32.xlu1 %v2432_v22, %s2268_s21  ;;  %s2274_s21 = smov 8  }
 0x237   : > { %682 = vrot.lane.b32.xlu1 %v2432_v22, %s2269_s22 }
 0x2a1   : > { %v2438_v26 = vpop.permute.xlu1 %537  ;;  %v2444_v28 = vpop.permute.xlu0 %543 }
 0x2a2   : > { %684 = vrot.lane.b32.xlu1 %v2438_v26, %s2269_s22  ;;  %v562_v40 = vcombine.low %v2438_v26, %v2444_v28  ;;  %v563_v41 = vcombine.high %v2438_v26, %v2444_v28 }
 0x2a4   : > { %v570_v46 = vrot.slane %v562_v40, %v2455_v39  ;;  %v577_v47 = vrot.slane %v563_v41, %v2455_v39 }
 0x2a5   : > { %v2441_v27 = vpop.permute.xlu1 %540 }
 0x2a6   : > { %686 = vrot.lane.b32.xlu1 %v2441_v27, %s2269_s22  ;;  %v546_v37 = vcombine.low %v2432_v22, %v2441_v27  ;;  %v547_v38 = vcombine.high %v2432_v22, %v2441_v27 }
 0x2a8   : > { %v554_v44 = vrot.slane %v546_v37, %v2455_v39  ;;  %v561_v45 = vrot.slane %v547_v38, %v2455_v39 }
 0x2a9   : > { %v683_v34 = vpop.permute.xlu1 %682 }
 0x2aa   : > { %688 = vrot.lane.b32.xlu1 %v2444_v28, %s2269_s22  ;;  %v578_v50 = vcombine.low %v554_v44, %v570_v46  ;;  %v579_v51 = vcombine.high %v554_v44, %v570_v46  ;;  %v594_v52 = vcombine.low %v561_v45, %v577_v47  ;;  %v595_v53 = vcombine.high %v561_v45, %v577_v47  ;;  %s2275_s22 = smov 24  }
 0x2ac   : > { %v586_v59 = vrot.slane %v578_v50, %v2466_v49  ;;  %v593_v60 = vrot.slane %v579_v51, %v2466_v49  ;;  %v602_v61 = vrot.slane %v594_v52, %v2466_v49  ;;  %v609_v62 = vrot.slane %v595_v53, %v2466_v49 }
 0x2ae   : > { %v614_v9 = vcombine.low %v586_v59, %v593_v60  ;;  %v1948_v10 = vcombine.high %v586_v59, %v593_v60  ;;  %v630_v11 = vcombine.low %v602_v61, %v609_v62  ;;  %v1949_v12 = vcombine.high %v602_v61, %v609_v62 }
 0x2b0   : > { %v621_v21 = vrot.slane %v614_v9, %v2455_v39  ;;  %v629_v23 = vrot.slane %v1948_v10, %v2455_v39  ;;  %v637_v24 = vrot.slane %v630_v11, %v2455_v39  ;;  %v645_v25 = vrot.slane %v1949_v12, %v2455_v39 }
 0x2b1   : > { %v1178_v11 = vand.u32 127, %v551_v31 }
 0x2b2   : > { %v646_v40 = vcombine.low %v621_v21, %v629_v23  ;;  %v662_v41 = vcombine.low %v637_v24, %v645_v25  ;;  %v663_v43 = vcombine.high %v637_v24, %v645_v25 }
 0x2b3   : > { %vm1179_vm3 = vcmp.ge.s32.totalorder %v2448_v33, %v1178_v11 }
 0x2b4   : > { %v654_v51 = vrot.slane %v646_v40, %v2466_v49  ;;  %v670_v52 = vrot.slane %v662_v41, %v2466_v49 }
 0x2b6   : > { %v678_v60 = vcombine.low %v654_v51, %v670_v52 }
 0x314   : > { %v685_v42 = vpop.permute.xlu1 %684 }
 0x318   : > { %v687_v48 = vpop.permute.xlu1 %686 }
 0x319   : > { %v694_v54 = vcombine.low %v683_v34, %v687_v48  ;;  %v695_v55 = vcombine.high %v683_v34, %v687_v48 }
 0x31b   : > { %v702_v63 = vrot.slane %v694_v54, %v2455_v39  ;;  %v709_v1 = vrot.slane %v695_v55, %v2455_v39 }
 0x31c   : > { %v689_v56 = vpop.permute.xlu1 %688 }
 0x31d   : > { %v710_v57 = vcombine.low %v685_v42, %v689_v56  ;;  %v711_v58 = vcombine.high %v685_v42, %v689_v56  ;;  %v647_v42 = vcombine.high %v621_v21, %v629_v23  ;;  %v677_v56 = vrot.slane %v663_v43, %v2466_v49 }
 0x31f   : > { %v718_v2 = vrot.slane %v710_v57, %v2455_v39  ;;  %v725_v3 = vrot.slane %v711_v58, %v2455_v39  ;;  %v661_v55 = vrot.slane %v647_v42, %v2466_v49 }
 0x321   : > { %v726_v4 = vcombine.low %v702_v63, %v718_v2  ;;  %v727_v5 = vcombine.high %v702_v63, %v718_v2  ;;  %v742_v6 = vcombine.low %v709_v1, %v725_v3  ;;  %v743_v7 = vcombine.high %v709_v1, %v725_v3 }
 0x322   : > { %v680_v61 = vcombine.low %v661_v55, %v677_v56  ;;  %v978_v63 = vpack.c.bf16 %v678_v60, %v678_v60  ;;  %v681_v9 = vcombine.high %v661_v55, %v677_v56 }
 0x323   : > { %v734_v13 = vrot.slane %v726_v4, %v2466_v49  ;;  %v741_v14 = vrot.slane %v727_v5, %v2466_v49  ;;  %v750_v15 = vrot.slane %v742_v6, %v2466_v49  ;;  %v757_v16 = vrot.slane %v743_v7, %v2466_v49 }
 0x324   : > { %v980_v1 = vpack.c.bf16 %v680_v61, %v680_v61  ;;  %v679_v4 = vcombine.high %v654_v51, %v670_v52  ;;  %v981_v10 = vpack.c.bf16 %v681_v9, %v681_v9 }
 0x325   : > { %v762_v17 = vcombine.low %v734_v13, %v741_v14  ;;  %v1950_v18 = vcombine.high %v734_v13, %v741_v14  ;;  %v778_v19 = vcombine.low %v750_v15, %v757_v16  ;;  %v1951_v20 = vcombine.high %v750_v15, %v757_v16 }
 0x326   : > { %v979_v6 = vpack.c.bf16 %v679_v4, %v679_v4 }
 0x327   : > { %v769_v29 = vrot.slane %v762_v17, %v2455_v39  ;;  %v777_v30 = vrot.slane %v1950_v18, %v2455_v39  ;;  %v785_v32 = vrot.slane %v778_v19, %v2455_v39  ;;  %v793_v34 = vrot.slane %v1951_v20, %v2455_v39 }
 0x329   : > { %v794_v35 = vcombine.low %v769_v29, %v777_v30  ;;  %v810_v36 = vcombine.low %v785_v32, %v793_v34  ;;  %v795_v37 = vcombine.high %v769_v29, %v777_v30  ;;  %v811_v38 = vcombine.high %v785_v32, %v793_v34 }
 0x32b   : > { %v802_v44 = vrot.slane %v794_v35, %v2466_v49  ;;  %v818_v45 = vrot.slane %v810_v36, %v2466_v49  ;;  %v809_v46 = vrot.slane %v795_v37, %v2466_v49  ;;  %v825_v47 = vrot.slane %v811_v38, %v2466_v49 }
 0x32d   : > { %v826_v48 = vcombine.low %v802_v44, %v818_v45  ;;  %v828_v50 = vcombine.low %v809_v46, %v825_v47  ;;  %v827_v59 = vcombine.high %v802_v44, %v818_v45  ;;  %v829_v3 = vcombine.high %v809_v46, %v825_v47 }
 0x32f   : > { %v982_v53 = vpack.c.bf16 %v826_v48, %v826_v48  ;;  %v984_v54 = vpack.c.bf16 %v828_v50, %v828_v50  ;;  %v983_v62 = vpack.c.bf16 %v827_v59, %v827_v59  ;;  %v985_v5 = vpack.c.bf16 %v829_v3, %v829_v3 }
 0x331   : > { %v991_v57 = vsel %vm986_vm2, %v982_v53, 0  ;;  %v1083_v58 = vsel %vm986_vm2, %v984_v54, 0  ;;  %v1037_v2 = vsel %vm986_vm2, %v983_v62, 0  ;;  %v1129_v7 = vsel %vm986_vm2, %v985_v5, 0 }
 0x332   : > { %2030 = vmatpush3.bf16.xpose.msra.mxu0 %v991_v57  ;;  %2042 = vmatpush3.bf16.xpose.msra.mxu1 %v1083_v58 }
 0x333   : > { %2035 = vmatprep.subr.bf16.mxu0 %v2264_v8  ;;  %2053 = vmatprep.subr.bf16.mxu1 %v2264_v8 }
 0x339   : > { %2032 = vmatmul.mubr.msk.bf16.vlgmr.msra.gmra.mrb[4].mxu0 %vm986_vm2, %v978_v63  ;;  %2044 = vmatmul.mubr.msk.bf16.vlgmr.msra.gmra.mrb[0].mxu1 %vm986_vm2, %v980_v1 }
 0x33a   : > { %2036 = vmatpush3.bf16.xpose.msra.mxu0 %v1037_v2  ;;  %2037 = vmatprep.mubr.msk.bf16.mxu0 %vm2265_vm1, %v2264_v8 }
 0x33b   : > { %2047 = vmatprep.subr.bf16.mxu0 %v2264_v8  ;;  %2055 = vmatprep.mubr.msk.bf16.mxu1 %vm2265_vm1, %v2264_v8 }
 0x341   : > { %2038 = vmatmul.mubr.msk.bf16.vlgmr.msra.gmra.mrb[8].mxu0 %vm986_vm2, %v979_v6 }
 0x342   : > { %2048 = vmatpush3.bf16.xpose.msra.mxu0 %v1129_v7  ;;  %2049 = vmatprep.mubr.msk.bf16.mxu0 %vm2265_vm1, %v2264_v8 }
 0x343   : > { %2059 = vmatprep.subr.bf16.mxu0 %v2264_v8 }
 0x349   : > { %2050 = vmatmul.mubr.msk.bf16.vlgmr.msra.gmra.mrb[12].mxu0 %vm986_vm2, %v981_v10 }
 0x34a   : > { %2061 = vmatprep.mubr.msk.bf16.mxu0 %vm2265_vm1, %v2264_v8 }
 0x40c   : > { %v1027_v12 = vpop.f32.mrb[4].mxu0  ;;  %v1119_v13 = vpop.f32.mrb[0].mxu1 }
 0x40d   : > { %v1171_v14 = vmul.f32 0.35355338, %v1027_v12  ;;  %v1173_v15 = vmul.f32 0.35355338, %v1119_v13  ;;  %v2033_v16 = vpop.f32.mrb[5].mxu0  ;;  %v2045_v17 = vpop.f32.mrb[1].mxu1 }
 0x40e   : > { %v1030_v18 = vpop.f32.mrb[6].mxu0  ;;  %v1122_v19 = vpop.f32.mrb[2].mxu1 }
 0x40f   : > { %v2034_v20 = vpop.f32.mrb[7].mxu0  ;;  %v2046_v21 = vpop.f32.mrb[3].mxu1  ;;  %v1182_v23 = vsel %vm1179_vm3, %v1171_v14, -1e+30  ;;  %v1184_v31 = vsel %vm1179_vm3, %v1173_v15, -1e+30 }
 0x410   : > { %v1186_v24 = vsel %vm986_vm2, %v1182_v23, -inf  ;;  %v1192_v29 = vsel %vm986_vm2, %v1184_v31, -inf }
 0x411   : > { %1187 = vmax.xlane.f32.xlu1 %v1186_v24 }
 0x414   : > { %v1073_v25 = vpop.f32.mrb[8].mxu0 }
 0x415   : > { %v1172_v30 = vmul.f32 0.35355338, %v1073_v25  ;;  %1193 = vmax.xlane.f32.xlu1 %v1192_v29  ;;  %v2039_v32 = vpop.f32.mrb[9].mxu0 }
 0x416   : > { %v1076_v34 = vpop.f32.mrb[10].mxu0 }
 0x417   : > { %v2040_v35 = vpop.f32.mrb[11].mxu0  ;;  %v1183_v36 = vsel %vm1179_vm3, %v1172_v30, -1e+30 }
 0x418   : > { %v1189_v37 = vsel %vm986_vm2, %v1183_v36, -inf }
 0x419   : > { %1190 = vmax.xlane.f32.xlu0 %v1189_v37 }
 0x41c   : > { %v1165_v38 = vpop.f32.mrb[12].mxu0 }
 0x41d   : > { %v1174_v40 = vmul.f32 0.35355338, %v1165_v38  ;;  %v2051_v41 = vpop.f32.mrb[13].mxu0 }
 0x41e   : > { %v1168_v42 = vpop.f32.mrb[14].mxu0 }
 0x41f   : > { %v2052_v43 = vpop.f32.mrb[15].mxu0  ;;  %v1185_v44 = vsel %vm1179_vm3, %v1174_v40, -1e+30 }
 0x420   : > { %v1195_v45 = vsel %vm986_vm2, %v1185_v44, -inf }
 0x421   : > { %1196 = vmax.xlane.f32.xlu0 %v1195_v45 }
 0x426   : > { %830 = vrot.lane.b32.xlu1 %v2432_v22, %s2272_s23 }
 0x49e   : > { %v1188_v46 = vpop.xlane.xlu1 %1187 }
 0x49f   : > { %v1198_v47 = vsub.f32 %v1182_v23, %v1188_v46 }
 0x4a1   : > { %v1202_v48 = vmul.f32 1.442695, %v1198_v47 }
 0x4a2   : > { %v1194_v57 = vpop.xlane.xlu1 %1193 }
 0x4a3   : > { %2180 = vpow2.f32 %v1202_v48  ;;  %v1200_v58 = vsub.f32 %v1184_v31, %v1194_v57 }
 0x4a5   : > { %v1206_v60 = vmul.f32 1.442695, %v1200_v58 }
 0x4a6   : > { %v1191_v50 = vpop.xlane.xlu0 %1190 }
 0x4a7   : > { %v1199_v51 = vsub.f32 %v1183_v36, %v1191_v50 }
 0x4a9   : > { %v1204_v52 = vmul.f32 1.442695, %v1199_v51 }
 0x4ab   : > { %2182 = vpow2.f32 %v1204_v52 }
 0x4ad   : > { %v2531_v53 = vpop.eup %2180 }
 0x4ae   : > { %v1210_v33 = vsel %vm986_vm2, %v2531_v53, 0.0  ;;  %v1197_v22 = vpop.xlane.xlu0 %1196 }
 0x4af   : > { %1211 = vadd.xlane.f32.xlu1 %v1210_v33  ;;  %v1201_v56 = vsub.f32 %v1185_v44, %v1197_v22 }
 0x4b1   : > { %v1208_v59 = vmul.f32 1.442695, %v1201_v56 }
 0x4b3   : > { %2184 = vpow2.f32 %v1208_v59 }
 0x4b4   : > { %2186 = vpow2.f32 %v1206_v60 }
 0x4b5   : > { %v2535_v54 = vpop.eup %2182 }
 0x4b6   : > { %v1213_v55 = vsel %vm986_vm2, %v2535_v54, 0.0 }
 0x4b7   : > { %1214 = vadd.xlane.f32.xlu0 %v1213_v55 }
 0x4bd   : > { %v2542_v61 = vpop.eup %2184 }
 0x4be   : > { %v1219_v62 = vsel %vm986_vm2, %v2542_v61, 0.0  ;;  %v2546_v63 = vpop.eup %2186 }
 0x4c0   : > { %834 = vrot.lane.b32.xlu1 %v2441_v27, %s2272_s23  ;;  %v1216_v27 = vsel %vm986_vm2, %v2546_v63, 0.0 }
 0x4c4   : > { %836 = vrot.lane.b32.xlu1 %v2444_v28, %s2272_s23 }
 0x4cd   : > { %832 = vrot.lane.b32.xlu0 %v2438_v26, %s2272_s23  ;;  %v831_v26 = vpop.permute.xlu1 %830  ;;  %s1984_s23 = sshll.u32 %s2368_s29, 7  ;;  %s1864_s29 = scalar_lea.sflag [#allocation3], %s429_s16 }
 0x4ce   : > { %s2685_s1 = scalar_lea.hbm %s2741_s13, %s1984_s23 }
 0x4e8   : > { %1220 = vadd.xlane.f32.xlu1 %v1219_v62 }
 0x4ec   : > { %1217 = vadd.xlane.f32.xlu0 %v1216_v27 }
 0x53c   : > { %v1212_v28 = vpop.xlane.xlu1 %1211 }
 0x53d   : > { %2188 = vrcp.f32 %v1212_v28 }
 0x540   : > { %v835_v1 = vpop.permute.xlu1 %834 }
 0x541   : > { %v842_v3 = vcombine.low %v831_v26, %v835_v1  ;;  %v843_v4 = vcombine.high %v831_v26, %v835_v1 }
 0x543   : > { %v850_v10 = vrot.slane %v842_v3, %v2455_v39  ;;  %v857_v11 = vrot.slane %v843_v4, %v2455_v39 }
 0x544   : > { %v1215_v2 = vpop.xlane.xlu0 %1214  ;;  %v837_v5 = vpop.permute.xlu1 %836 }
 0x545   : > { %2190 = vrcp.f32 %v1215_v2 }
 0x547   : > { %v2189_v40 = vpop.eup %2188 }
 0x548   : > { %v833_v6 = vpop.permute.xlu0 %832  ;;  %v1226_v51 = vmul.f32 %v2189_v40, %v2531_v53 }
 0x549   : > { %v858_v7 = vcombine.low %v833_v6, %v837_v5  ;;  %v859_v9 = vcombine.high %v833_v6, %v837_v5 }
 0x54a   : > { %v1230_v59 = vpack.c.bf16 %v1226_v51, %v1226_v51 }
 0x54b   : > { %v866_v12 = vrot.slane %v858_v7, %v2455_v39  ;;  %v873_v13 = vrot.slane %v859_v9, %v2455_v39 }
 0x54d   : > { %v874_v14 = vcombine.low %v850_v10, %v866_v12  ;;  %v875_v15 = vcombine.high %v850_v10, %v866_v12  ;;  %v890_v16 = vcombine.low %v857_v11, %v873_v13  ;;  %v891_v17 = vcombine.high %v857_v11, %v873_v13 }
 0x54f   : > { %v882_v18 = vrot.slane %v874_v14, %v2466_v49  ;;  %v889_v19 = vrot.slane %v875_v15, %v2466_v49  ;;  %v898_v20 = vrot.slane %v890_v16, %v2466_v49  ;;  %v905_v21 = vrot.slane %v891_v17, %v2466_v49  ;;  %v2191_v45 = vpop.eup %2190 }
 0x550   : > { %v1227_v52 = vmul.f32 %v2191_v45, %v2535_v54 }
 0x551   : > { %v910_v23 = vcombine.low %v882_v18, %v889_v19  ;;  %v1952_v24 = vcombine.high %v882_v18, %v889_v19  ;;  %v926_v31 = vcombine.low %v898_v20, %v905_v21  ;;  %v1953_v25 = vcombine.high %v898_v20, %v905_v21 }
 0x552   : > { %v1231_v60 = vpack.c.bf16 %v1227_v52, %v1227_v52 }
 0x553   : > { %v917_v29 = vrot.slane %v910_v23, %v2455_v39  ;;  %v925_v30 = vrot.slane %v1952_v24, %v2455_v39  ;;  %v933_v32 = vrot.slane %v926_v31, %v2455_v39  ;;  %v941_v34 = vrot.slane %v1953_v25, %v2455_v39 }
 0x555   : > { %v942_v35 = vcombine.low %v917_v29, %v925_v30  ;;  %v958_v36 = vcombine.low %v933_v32, %v941_v34  ;;  %v943_v37 = vcombine.high %v917_v29, %v925_v30  ;;  %v959_v38 = vcombine.high %v933_v32, %v941_v34  ;;  %v2166_v32 = vld [vmem:[%s2733_s5] sm:$0xff]  }
 0x557   : > { %v950_v41 = vrot.slane %v942_v35, %v2466_v49  ;;  %v966_v42 = vrot.slane %v958_v36, %v2466_v49  ;;  %v957_v43 = vrot.slane %v943_v37, %v2466_v49  ;;  %v973_v44 = vrot.slane %v959_v38, %v2466_v49 }
 0x559   : > { %v974_v46 = vcombine.low %v950_v41, %v966_v42  ;;  %v975_v47 = vcombine.high %v950_v41, %v966_v42  ;;  %v976_v48 = vcombine.low %v957_v43, %v973_v44  ;;  %v977_v50 = vcombine.high %v957_v43, %v973_v44  ;;  %v2167_v43 = vld [vmem:[%s2733_s5 + $0x8] sm:$0xff]  }
 0x55b   : > { %v1234_v33 = vpack.c.bf16 %v974_v46, %v974_v46  ;;  %v1235_v55 = vpack.c.bf16 %v975_v47, %v975_v47  ;;  %v1236_v57 = vpack.c.bf16 %v976_v48, %v976_v48  ;;  %v1237_v58 = vpack.c.bf16 %v977_v50, %v977_v50 }
 0x55d   : > { %v1243_v22 = vsel %vm1241_vm4, %v1234_v33, 0  ;;  %v1289_v56 = vsel %vm1241_vm4, %v1235_v55, 0  ;;  %v1335_v53 = vsel %vm1241_vm4, %v1236_v57, 0  ;;  %v1381_v54 = vsel %vm1241_vm4, %v1237_v58, 0 }
 0x55e   : > { %2054 = vmatpush3.bf16.msra.mxu1 %v1243_v22  ;;  %2060 = vmatpush3.bf16.msra.mxu0 %v1289_v56 }
 0x55f   : > { %2065 = vmatprep.subr.bf16.mxu1 %v2264_v8  ;;  %2071 = vmatprep.subr.bf16.mxu0 %v2264_v8 }
 0x561   : > { %2056 = vmatmul.mubr.msk.bf16.vlgmr.msra.gmra.mrb[4].mxu1 %vm986_vm2, %v1230_v59  ;;  %2062 = vmatmul.mubr.msk.bf16.vlgmr.msra.gmra.mrb[16].mxu0 %vm986_vm2, %v1231_v60 }
 0x562   : > { %2066 = vmatpush3.bf16.msra.mxu1 %v1335_v53  ;;  %2072 = vmatpush3.bf16.msra.mxu0 %v1381_v54 }
 0x563   : > { %2073 = vmatprep.mubr.msk.bf16.mxu0 %vm2265_vm1, %v2264_v8  ;;  %2067 = vmatprep.mubr.msk.bf16.mxu1 %vm2265_vm1, %v2264_v8 }
 0x564   : > { %2077 = vmatprep.subr.bf16.mxu1 %v2264_v8  ;;  %2085 = vmatprep.subr.bf16.mxu0 %v2264_v8 }
 0x575   : > { %v1221_v62 = vpop.xlane.xlu1 %1220 }
 0x576   : > { %2192 = vrcp.f32 %v1221_v62 }
 0x579   : > { %v1218_v27 = vpop.xlane.xlu0 %1217 }
 0x57a   : > { %2194 = vrcp.f32 %v1218_v27 }
 0x580   : > { %v2193_v26 = vpop.eup %2192 }
 0x581   : > { %v1229_v28 = vmul.f32 %v2193_v26, %v2542_v61 }
 0x583   : > { %v1233_v1 = vpack.c.bf16 %v1229_v28, %v1229_v28 }
 0x584   : > { %v2195_v2 = vpop.eup %2194 }
 0x585   : > { %v1228_v3 = vmul.f32 %v2195_v2, %v2546_v63  ;;  %2074 = vmatmul.mubr.msk.bf16.vlgmr.msra.gmra.mrb[20].mxu0 %vm986_vm2, %v1233_v1 }
 0x586   : > { %2089 = vmatprep.mubr.msk.bf16.mxu0 %vm2265_vm1, %v2264_v8 }
 0x587   : > { %v1232_v4 = vpack.c.bf16 %v1228_v3, %v1228_v3 }
 0x589   : > { %2068 = vmatmul.mubr.msk.bf16.vlgmr.msra.gmra.mrb[8].mxu1 %vm986_vm2, %v1232_v4  ;;  %v1964_v4 = vld [vmem:[%s2734_s6] ss:$0 sm:$0xff] }
 0x58a   : > { %2081 = vmatprep.mubr.msk.bf16.mxu1 %vm2265_vm1, %v2264_v8  ;;  %2078 = vmatpush3.bf16.msra.mxu1 %v2166_v32  ;;  %v2171_v32 = vld [vmem:[%s2739_s11 + $0x8] sm:$0xff]  }
 0x58b   : > { %2079 = vmatprep.subr.bf16.mxu1 %v2264_v8 }
 0x58e   : > { %2080 = vmatpush3.bf16.msra.mxu1 %v2167_v43 }
 0x58f   : > { %2093 = vmatprep.subr.bf16.mxu1 %v2264_v8 }
 0x634   : > { %v1279_v5 = vpop.f32.mrb[4].mxu1  ;;  %v1325_v6 = vpop.f32.mrb[16].mxu0 }
 0x635   : > { %v2057_v7 = vpop.f32.mrb[5].mxu1  ;;  %v2063_v9 = vpop.f32.mrb[17].mxu0 }
 0x636   : > { %v1282_v61 = vpop.f32.mrb[6].mxu1  ;;  %v1328_v10 = vpop.f32.mrb[18].mxu0 }
 0x637   : > { %v2058_v11 = vpop.f32.mrb[7].mxu1  ;;  %v2064_v12 = vpop.f32.mrb[19].mxu0 }
 0x658   : > { %v1417_v63 = vpop.f32.mrb[20].mxu0 }
 0x659   : > { %v1439_v13 = vcombine.low %v1325_v6, %v1417_v63  ;;  %v1440_v14 = vcombine.high %v1325_v6, %v1417_v63  ;;  %v2075_v15 = vpop.f32.mrb[21].mxu0 }
 0x65a   : > { %v1420_v16 = vpop.f32.mrb[22].mxu0 }
 0x65b   : > { %v2076_v17 = vpop.f32.mrb[23].mxu0  ;;  %v1447_v24 = vrot.slane %v1439_v13, %v2455_v39  ;;  %v1454_v31 = vrot.slane %v1440_v14, %v2455_v39  ;;  %v2168_v16 = vld [vmem:[%s2737_s9] sm:$0xff]  }
 0x65c   : > { %v1371_v18 = vpop.f32.mrb[8].mxu1  ;;  %2086 = vmatpush3.bf16.msra.mxu0 %v2168_v16  ;;  %v2170_v17 = vld [vmem:[%s2739_s11] sm:$0xff]  }
 0x65d   : > { %v1423_v19 = vcombine.low %v1279_v5, %v1371_v18  ;;  %v1424_v20 = vcombine.high %v1279_v5, %v1371_v18  ;;  %v2069_v21 = vpop.f32.mrb[9].mxu1  ;;  %2087 = vmatprep.subr.bf16.mxu0 %v2264_v8 }
 0x65e   : > { %v1374_v23 = vpop.f32.mrb[10].mxu1 }
 0x65f   : > { %v1431_v25 = vrot.slane %v1423_v19, %v2455_v39  ;;  %v1438_v29 = vrot.slane %v1424_v20, %v2455_v39  ;;  %v2070_v30 = vpop.f32.mrb[11].mxu1  ;;  %v1968_v23 = vld [vmem:[%s2735_s7] ss:$0 sm:$0xff] }
 0x661   : > { %v1455_v34 = vcombine.low %v1431_v25, %v1447_v24  ;;  %v1456_v35 = vcombine.high %v1431_v25, %v1447_v24  ;;  %v1471_v36 = vcombine.low %v1438_v29, %v1454_v31  ;;  %v1472_v37 = vcombine.high %v1438_v29, %v1454_v31  ;;  %v1969_v31 = vld [vmem:[%s2736_s8] ss:$0 sm:$0xff] }
 0x663   : > { %v1463_v38 = vrot.slane %v1455_v34, %v2466_v49  ;;  %v1470_v40 = vrot.slane %v1456_v35, %v2466_v49  ;;  %v1479_v41 = vrot.slane %v1471_v36, %v2466_v49  ;;  %v1486_v42 = vrot.slane %v1472_v37, %v2466_v49  ;;  %v2172_v34 = vld [vmem:[%s2739_s11 + $0x10] sm:$0xff]   ;;  %v2173_v35 = vld [vmem:[%s2739_s11 + $0x18] sm:$0xff]   ;;  %v2174_v36 = vld [vmem:[%s2739_s11 + $0x20] sm:$0xff]  }
 0x664   : > { %v2175_v37 = vld [vmem:[%s2739_s11 + $0x28] sm:$0xff]  }
 0x665   : > { %v1491_v44 = vcombine.low %v1463_v38, %v1470_v40  ;;  %v1962_v45 = vcombine.high %v1463_v38, %v1470_v40  ;;  %v1507_v46 = vcombine.low %v1479_v41, %v1486_v42  ;;  %v1963_v47 = vcombine.high %v1479_v41, %v1486_v42  ;;  %v2176_v38 = vld [vmem:[%s2739_s11 + $0x30] sm:$0xff]   ;;  %v2177_v40 = vld [vmem:[%s2739_s11 + $0x38] sm:$0xff]   ;;  %v1970_v41 = vld [vmem:[%s2738_s10] ss:$0 sm:$0xff] }
 0x667   : > { %v1498_v48 = vrot.slane %v1491_v44, %v2455_v39  ;;  %v1506_v50 = vrot.slane %v1962_v45, %v2455_v39  ;;  %v1514_v51 = vrot.slane %v1507_v46, %v2455_v39  ;;  %v1522_v52 = vrot.slane %v1963_v47, %v2455_v39 }
 0x669   : > { %v1524_v33 = vcombine.high %v1498_v48, %v1506_v50  ;;  %v1540_v55 = vcombine.high %v1514_v51, %v1522_v52  ;;  %v1523_v22 = vcombine.low %v1498_v48, %v1506_v50  ;;  %v1539_v56 = vcombine.low %v1514_v51, %v1522_v52 }
 0x66b   : > { %v1538_v57 = vrot.slane %v1524_v33, %v2466_v49  ;;  %v1554_v58 = vrot.slane %v1540_v55, %v2466_v49  ;;  %v1531_v59 = vrot.slane %v1523_v22, %v2466_v49  ;;  %v1547_v60 = vrot.slane %v1539_v56, %v2466_v49 }
 0x66d   : > { %v1557_v53 = vcombine.low %v1538_v57, %v1554_v58  ;;  %v1556_v54 = vcombine.high %v1531_v59, %v1547_v60  ;;  %v1558_v62 = vcombine.high %v1538_v57, %v1554_v58  ;;  %v1555_v27 = vcombine.low %v1531_v59, %v1547_v60  ;;  %v1974_v57 = vld [vmem:[%s2740_s12] ss:$0 sm:$0xff] }
 0x66f   : > { %1564 = vrot.lane.b32.xlu1 %v1557_v53, %s2273_s20  ;;  %1560 = vrot.lane.b32.xlu0 %v1556_v54, %s2274_s21  ;;  %s1940_s20 = sshll.u32 %s429_s16, 3  ;;  %s2276_s21 = smov [#allocation2]  }
 0x670   : > { %s431_s24 = scalar_lea.vmem [#allocation2], %s1940_s20 }
 0x671   : > { %s1877_s30 = sshll.u32 %s431_s24, 4  ;;  %s2687_s30 = int_to_ptr.vmem [resolvable:$true] %s1877_s30 }
 0x672   : > { %s2200_s20 = scalar_lea.vmem %s2687_s30, 128 }
 0x673   : > { %1568 = vrot.lane.b32.xlu0 %v1558_v62, %s2275_s22  ;;  %p2201_p11 = scmp.ne.s32.totalorder %s2687_s30, %s2200_s20  ;;  %s2204_s22 = sshll.u32 %s2276_s21, 4  ;;  %s2205_s22 = int_to_ptr.vmem [resolvable:$false] %s2204_s22 }
 0x674   : > { %s2206_s2 = scalar_lea.vmem %s2205_s22, 256  ;;  %p2207_p0 = scmp.lt.s32.totalorder %s2687_s30, %s2205_s22 }
 0x675   : > { %p2202_p12 = pnand %p2201_p11, %p2385_p5  ;;  %p2208_p1 = scmp.lt.s32.totalorder %s2206_s2, %s2200_s20 }
 0x677   : > { %p2203_p13 = pneg %p2202_p12  ;;  %p2209_p2 = por %p2208_p1, %p2207_p0 }
 0x679   : > { %p2210_p3 = pnand %p2209_p2, %p2203_p13 }
 0x6e1   : > { %v1561_v39 = vpop.permute.xlu0 %1560  ;;  %v1565_v26 = vpop.permute.xlu1 %1564 }
 0x6e2   : > { %v1571_v28 = vsel %vm986_vm2, %v1555_v27, %v1561_v39 }
 0x6e3   : > { %v1573_v2 = vsel %vm1572_vm5, %v1571_v28, %v1565_v26 }
 0x6e5   : > { %v1569_v1 = vpop.permute.xlu0 %1568 }
 0x6e6   : > { %v1575_v3 = vsel %vm1574_vm6, %v1573_v2, %v1569_v1 }
 0x6e7   : > { %v1576_v49 = vpack.c.bf16 %v1575_v3, %v1575_v3 }
 0x6e9   : > { %2082 = vmatmul.mubr.msk.bf16.vlgmr.msra.gmra.mrb[12].mxu1 %vm440_vm0, %v1576_v49 }
 0x6ea   : > { %2109 = vmatprep.mubr.msk.bf16.mxu1 %vm2265_vm1, %v2264_v8  ;;  %2094 = vmatpush3.bf16.msra.mxu1 %v2170_v17 }
 0x6eb   : > { %2095 = vmatprep.subr.bf16.mxu1 %v2264_v8 }
 0x6ee   : > { %2096 = vmatpush3.bf16.msra.mxu1 %v2171_v32 }
 0x6ef   : > { %2097 = vmatprep.subr.bf16.mxu1 %v2264_v8 }
 0x6f2   : > { %2098 = vmatpush3.bf16.msra.mxu1 %v2172_v34 }
 0x6f3   : > { %2099 = vmatprep.subr.bf16.mxu1 %v2264_v8 }
 0x6f6   : > { %2100 = vmatpush3.bf16.msra.mxu1 %v2173_v35 }
 0x6f7   : > { %2101 = vmatprep.subr.bf16.mxu1 %v2264_v8 }
 0x6fa   : > { %2102 = vmatpush3.bf16.msra.mxu1 %v2174_v36 }
 0x6fb   : > { %2103 = vmatprep.subr.bf16.mxu1 %v2264_v8 }
 0x6fe   : > { %2104 = vmatpush3.bf16.msra.mxu1 %v2175_v37 }
 0x6ff   : > { %2105 = vmatprep.subr.bf16.mxu1 %v2264_v8 }
 0x702   : > { %2106 = vmatpush3.bf16.msra.mxu1 %v2176_v38 }
 0x703   : > { %2107 = vmatprep.subr.bf16.mxu1 %v2264_v8 }
 0x706   : > { %2108 = vmatpush3.bf16.msra.mxu1 %v2177_v40 }
 0x7bc   : > { %v1637_v5 = vpop.f32.mrb[12].mxu1 }
 0x7bd   : > { %v1638_v6 = vadd.f32 %v1964_v4, %v1637_v5  ;;  %v2083_v7 = vpop.f32.mrb[13].mxu1 }
 0x7be   : > { %v1640_v9 = vpop.f32.mrb[14].mxu1 }
 0x7bf   : > { %v2622_v61 = vadd.f32 %v1638_v6, %v2400_v0  ;;  %v2084_v10 = vpop.f32.mrb[15].mxu1  ;;  %v2169_v0 = vld [vmem:[%s2737_s9 + $0x8] sm:$0xff]  }
 0x7c0   : > { %2088 = vmatpush3.bf16.msra.mxu0 %v2169_v0 }
 0x7c1   : > { %v1646_v11 = vsel %vm440_vm0, %v2622_v61, 0.0 }
 0x7c2   : > { %1647 = vadd.xlane.f32.xlu1 %v1646_v11 }
 0x84f   : > { %v1648_v12 = vpop.xlane.xlu1 %1647 }
 0x850   : > { %v1649_v63 = vmul.f32 0.03125, %v1648_v12 }
 0x852   : > { %v1650_v13 = vsub.f32 %v2622_v61, %v1649_v63 }
 0x854   : > { %v1651_v14 = vmul.f32 %v1650_v13, %v1650_v13 }
 0x856   : > { %v1652_v15 = vsel %vm440_vm0, %v1651_v14, 0.0 }
 0x857   : > { %1653 = vadd.xlane.f32.xlu0 %v1652_v15 }
 0x8e4   : > { %v1654_v18 = vpop.xlane.xlu0 %1653 }
 0x8e5   : > { %v1655_v19 = vmul.f32 0.03125, %v1654_v18 }
 0x8e7   : > { %v1656_v20 = vadd.f32 1e-05, %v1655_v19 }
 0x8e9   : > { %2196 = vrsqrt.f32 %v1656_v20 }
 0x8f3   : > { %v2197_v21 = vpop.eup %2196 }
 0x8f4   : > { %v1658_v24 = vmul.f32 %v2197_v21, %v1650_v13 }
 0x8f6   : > { %v1665_v25 = vmul.f32 %v1968_v23, %v1658_v24 }
 0x8f8   : > { %v1672_v29 = vadd.f32 %v1969_v31, %v1665_v25 }
 0x8fa   : > { %v1673_v30 = vpack.c.bf16 %v1672_v29, %v1672_v29 }
 0x8fc   : > { %2090 = vmatmul.mubr.msk.bf16.vlgmr.msra.gmra.mrb[24].mxu0 %vm440_vm0, %v1673_v30 }
 0x9cf   : > { %v1734_v42 = vpop.f32.mrb[24].mxu0 }
 0x9d0   : > { %v1735_v43 = vadd.f32 %v1970_v41, %v1734_v42  ;;  %v2091_v44 = vpop.f32.mrb[25].mxu0 }
 0x9d1   : > { %v1737_v45 = vpop.f32.mrb[26].mxu0 }
 0x9d2   : > { %v1741_v46 = vmul.f32 0.044715, %v1735_v43  ;;  %v2092_v47 = vpop.f32.mrb[27].mxu0  ;;  %v1740_v8 = vmul.f32 0.5, %v1735_v43 }
 0x9d4   : > { %v1742_v48 = vmul.f32 %v1741_v46, %v1735_v43 }
 0x9d6   : > { %v1743_v50 = vmul.f32 %v1742_v48, %v1735_v43 }
 0x9d8   : > { %v1744_v51 = vadd.f32 %v1743_v50, %v1735_v43 }
 0x9da   : > { %v1745_v52 = vmul.f32 0.7978846, %v1744_v51 }
 0x9dc   : > { %2198 = vtanh.f32 %v1745_v52 }
 0x9e6   : > { %v2199_v33 = vpop.eup %2198 }
 0x9e7   : > { %v1747_v55 = vadd.f32 1.0, %v2199_v33 }
 0x9e9   : > { %v1748_v22 = vmul.f32 %v1747_v55, %v1740_v8 }
 0x9eb   : > { %v1749_v56 = vpack.c.bf16 %v1748_v22, %v1748_v22 }
 0x9ed   : > { %2110 = vmatmul.mubr.bf16.vlgmr.msra.gmra.mrb[16].mxu1 %v1749_v56 }
 0xac0   : > { %v1855_v58 = vpop.f32.mrb[16].mxu1 }
 0xac1   : > { %v1856_v59 = vadd.f32 %v1974_v57, %v1855_v58  ;;  %v2111_v60 = vpop.f32.mrb[17].mxu1 }
 0xac2   : > { %v1858_v53 = vpop.f32.mrb[18].mxu1 }
 0xac3   : > { %v1861_v54 = vadd.f32 %v1856_v59, %v2622_v61  ;;  %v2112_v62 = vpop.f32.mrb[19].mxu1 }
 0xac5   : > { %1862 = vst.msk [vmem:[%s431_s24] sm:$0xff] %vm440_vm0, %v1861_v54 }
 0xac6   : > { %2213 = shalt.err (!%p2210_p3)
}
 0xac7   : > { %s2214_s0 = scalar_lea.hbm %s2685_s1, 128  ;;  %s2218_s24 = scalar_lea.hbm %s2741_s13, 256 }
 0xac8   : > { %p2215_p4 = scmp.ne.s32.totalorder %s2685_s1, %s2214_s0  ;;  %p2219_p9 = scmp.lt.u32.totalorder %s2685_s1, %s2741_s13 }
 0xac9   : > { %p2220_p10 = scmp.lt.u32.totalorder %s2218_s24, %s2214_s0  ;;  %p2222_p12 = scmp.lt.u32.totalorder %s2214_s0, %s2685_s1 }
 0xaca   : > { %p2216_p7 = pnand %p2215_p4, %p2385_p5 }
 0xacb   : > { %p2221_p11 = por %p2220_p10, %p2219_p9 }
 0xacc   : > { %p2217_p8 = pneg %p2216_p7 }
 0xacd   : > { %p2223_p13 = por %p2222_p12, %p2221_p11 }
 0xacf   : > { %p2224_p0 = pnand %p2223_p13, %p2217_p8 }
 0xad1   : > { %2227 = shalt.err (!%p2224_p0)
}
 0xad2   : > { %2113 = dma.vmem_to_hbm [thread:$0]  (%p2385_p5), %s2687_s30, 128, %s2685_s1, %s1864_s29  }
 0xad3 PF: > { %p2119_p1 = scmp.ge.s32.totalorder %s2262_s28, 2  ;;  %s1889_s2 = sand.u32 1, %s2250_s25  }
 0xad4   : > { %s1890_s20 = scalar_lea.sflag [#allocation3], %s1889_s2 }
 0xad5   : > { %p2116_p2 = pnand %p2119_p1, %p2389_p6 }
 0xad7   : > { %2245 = dma.done.wait (!%p2116_p2), %s1890_s20, 128  }
 0xad8   : > { %2247 = vsyncadd (!%p2116_p2), %s1890_s20, 4294967168  ;;  %p23_p3 = scmp.ge.s32.totalorder %s2372_s14, 4   ;;  %s2750_s25 = smov %s2254_s26 }
 0xad9   : > { %s2751_s26 = smov %s2258_s27  ;;  %s2752_s27 = smov %s2383_s17 }
 0xada   : > { %s2753_s28 = smov %s2372_s14  ;;  %25 = sbr.rel (!%p23_p3) target bundleno = 7 (0x7), region = 107 }
 0xae1   :  { %1895 = vsyncpa [#allocation3], 1 }
 0xae2   :  { %1897 = vsyncpa [#allocation3 + $0x1], 1 }

</bundles_post_ra>
